<compile_context>
chip_gen: v7x
topology: tpu7x:2x2x1
jax: 0.10.0
libtpu: 0.0.40
codegen_flags: <defaults>
</compile_context>

<pallas_src>
import functools
import math

import jax
import jax.numpy as jnp
from jax import lax
from jax.experimental import pallas as pl
from jax.experimental.pallas import tpu as pltpu


def _smooth_loss_kernel(preds_ref, tgt_ref, out_ref, *, label_smoothing, hw):
    # preds_ref: (1, C, Tpx)  logits block — classes on sublanes, pixels on lanes
    # tgt_ref:   (1, 1, Tpx)  int32 class ids
    # out_ref:   (1, 8, 128)  f32 — this tile's partial raw sum stored at [0, 0, 0]
    #
    # TODO(synk): for tiny C (<8 f32 / <16 bf16) the sublane axis is mostly
    # padding; a (C, k, Tpx) packing would cut VPU/EUP work when compute-bound.
    x = preds_ref[0].astype(jnp.float32)                      # (C, Tpx)
    n_classes, tile_px = x.shape

    # Numerically-stable shifted logits.  logp = z - lse is NOT materialized;
    # per-pixel reductions of z are combined with lse algebraically below.
    m = jnp.max(x, axis=0, keepdims=True)                     # (1, Tpx)
    z = x - m
    lse = jnp.log(jnp.sum(jnp.exp(z), axis=0, keepdims=True))  # (1, Tpx)

    tgt = tgt_ref[0]                                          # (1, Tpx) int32
    cls_iota = lax.broadcasted_iota(jnp.int32, (n_classes, tile_px), 0)
    onehot = cls_iota == tgt                                  # (C, Tpx) bool
    z_tgt = jnp.sum(jnp.where(onehot, z, 0.0),
                    axis=0, keepdims=True)                    # (1, Tpx)

    if label_smoothing > 0:
        # KLDivLoss(reduction='mean'): per pixel  sum_c t_c*(log t_c - logp_c)
        #   t_c = hi at the target class, lo elsewhere.
        lo = label_smoothing / n_classes
        hi = 1.0 - label_smoothing + lo
        # sum_c t*log(t) is a compile-time scalar constant (no per-element log).
        tlogt = hi * math.log(hi) + (n_classes - 1) * lo * math.log(lo)
        sum_z = jnp.sum(z, axis=0, keepdims=True)             # (1, Tpx)
        # sum_logp = sum_z - C*lse ,  logp_tgt = z_tgt - lse
        per_px = (tlogt
                  - lo * (sum_z - n_classes * lse)
                  - (hi - lo) * (z_tgt - lse))
    else:
        # NLLLoss: -logp[target] = lse - z_tgt
        per_px = lse - z_tgt

    # Mask the ragged tail of the last pixel tile (select, never multiply,
    # so garbage/NaN in undefined tail lanes cannot propagate).
    if hw % tile_px:
        p = pl.program_id(1)
        lane = lax.broadcasted_iota(jnp.int32, (1, tile_px), 1)
        per_px = jnp.where(p * tile_px + lane < hw, per_px, 0.0)

    partial = jnp.sum(per_px)                                 # scalar raw sum

    sub = lax.broadcasted_iota(jnp.int32, (1, 8, 128), 1)
    ln = lax.broadcasted_iota(jnp.int32, (1, 8, 128), 2)
    out_ref[...] = jnp.where((sub == 0) & (ln == 0), partial, 0.0)


def smooth_criterion(preds, targets, label_smoothing=0.0,
                     target_block_bytes=2 << 20):
    """Pallas implementation of Smooth_Critierion.forward (NCHW logits)."""
    N, C, H, W = preds.shape
    HW = H * W

    # Free reshapes only — no transpose, no pad, no wrapper-side upcast.
    x = preds.reshape(N, C, HW)
    t = targets.reshape(N, 1, HW).astype(jnp.int32)

    itemsize = jnp.dtype(preds.dtype).itemsize

    # Per-pixel VMEM bytes per step: double-buffered preds block + targets
    # block + ~4 live full-size f32 intermediates (x, z, exp(z), select tmp).
    bytes_per_px = 2 * C * itemsize + 2 * 4 + 4 * C * 4
    vmem_work_budget = 24 << 20          # keeps the step inside v7x's 64 MiB VMEM
    max_px_vmem = max(128, (vmem_work_budget // bytes_per_px) // 128 * 128)

    # Dtype-aware HBM block target: ~target_block_bytes of raw preds traffic
    # per grid step (amortizes the ~0.35 us per-step overhead), lane axis a
    # multiple of 128 (or full H*W extent).
    tile_px = max(128, (target_block_bytes // (itemsize * C)) // 128 * 128)
    tile_px = min(tile_px, max_px_vmem)

    # Occupancy guard: small batch + huge tile would leave one v7x TensorCore
    # idle under megacore sharding; aim for ~8 grid steps when splittable.
    min_steps = 8
    if N * pl.cdiv(HW, tile_px) < min_steps and HW > 128:
        want_p = pl.cdiv(min_steps, N)
        occ_tile = max(128, pl.cdiv(pl.cdiv(HW, want_p), 128) * 128)
        if occ_tile < HW:
            tile_px = min(tile_px, occ_tile)

    if tile_px >= HW:
        tile_px = HW                      # full-extent block is always layout-legal
    grid_p = pl.cdiv(HW, tile_px)

    # Estimated per-step VMEM footprint; raise the scoped limit to match.
    est_vmem = bytes_per_px * tile_px + 2 * 8 * 128 * 4
    if est_vmem > (44 << 20):
        # TODO(synk): add a class-tiled online-softmax path for very large C.
        raise NotImplementedError(
            "class axis too large for a single-block softmax; needs class tiling")
    vmem_limit = int(min(48 << 20, max(32 << 20, 2 * est_vmem)))

    kernel = functools.partial(
        _smooth_loss_kernel,
        label_smoothing=float(label_smoothing),
        hw=HW,
    )

    partials = pl.pallas_call(
        kernel,
        out_shape=jax.ShapeDtypeStruct((N, 8 * grid_p, 128), jnp.float32),
        grid=(N, grid_p),
        in_specs=[
            pl.BlockSpec((1, C, tile_px), lambda n, p: (n, 0, p)),
            pl.BlockSpec((1, 1, tile_px), lambda n, p: (n, 0, p)),
        ],
        out_specs=pl.BlockSpec((1, 8, 128), lambda n, p: (n, p, 0)),
        compiler_params=pltpu.CompilerParams(
            dimension_semantics=("parallel", "parallel"),
            vmem_limit_bytes=vmem_limit),
    )(x, t)

    # Final reduce + single divide in JAX (pairwise-summed, more robust than a
    # serial in-kernel scalar accumulator).
    total = jnp.sum(partials)
    denom = N * C * H * W if label_smoothing > 0 else N * H * W
    return total / jnp.float32(denom)


def _reference(preds, targets, label_smoothing):
    """Pure-JAX reference matching the PyTorch module."""
    logp = jax.nn.log_softmax(preds.astype(jnp.float32), axis=1)
    C = preds.shape[1]
    onehot = jax.nn.one_hot(targets, C, axis=1, dtype=jnp.float32)  # (N,C,H,W)
    if label_smoothing > 0:
        t = onehot * (1.0 - label_smoothing) + label_smoothing / C
        return jnp.mean(t * (jnp.log(t) - logp))
    return -jnp.mean(jnp.sum(onehot * logp, axis=1))


if __name__ == "__main__":
    key = jax.random.PRNGKey(0)
    kp, kt = jax.random.split(key)

    N, C, H, W = 2, 4, 16, 16
    preds = jax.random.normal(kp, (N, C, H, W), dtype=jnp.float32)
    targets = jax.random.randint(kt, (N, H, W), 0, C, dtype=jnp.int32)

    # exercise both branches: NLL (label_smoothing=0) and KLDiv (label_smoothing>0)
    for ls in (0.0, 0.1):
        loss = smooth_criterion(preds, targets, label_smoothing=ls)
        loss = jax.block_until_ready(loss)
        ref = _reference(preds, targets, ls)
        assert jnp.allclose(loss, ref, atol=1e-5, rtol=1e-5), (ls, loss, ref)

    print("KERNEL_OK")
</pallas_src>

<mosaic_0001>
module attributes {stable_mosaic.version = 11 : i64} {
  func.func @_smooth_loss_kernel(%arg0: i32, %arg1: i32, %arg2: memref<1x4x128xf32, #tpu.memory_space<vmem>>, %arg3: memref<1x1x128xi32, #tpu.memory_space<vmem>>, %arg4: memref<1x8x128xf32, #tpu.memory_space<vmem>>) attributes {dimension_semantics = [#tpu.dimension_semantics<parallel>, #tpu.dimension_semantics<parallel>], iteration_bounds = array<i64: 2, 2>, scalar_prefetch = 0 : i64, scratch_operands = 0 : i64, tpu.core_type = #tpu.core_type<tc>, window_params = [{transform_indices = @transform_0, window_bounds = array<i64: 1, 4, 128>}, {transform_indices = @transform_1, window_bounds = array<i64: 1, 1, 128>}, {transform_indices = @transform_2, window_bounds = array<i64: 1, 8, 128>}]} {
    %c0 = arith.constant 0 : index
    %c0_0 = arith.constant 0 : index
    %c0_1 = arith.constant 0 : index
    %0 = vector.load %arg2[%c0, %c0_0, %c0_1] : memref<1x4x128xf32, #tpu.memory_space<vmem>>, vector<1x4x128xf32>
    %1 = vector.shape_cast %0 : vector<1x4x128xf32> to vector<4x128xf32>
    %cst = arith.constant dense<0xFF800000> : vector<128xf32>
    %2 = vector.multi_reduction <maximumf>, %1, %cst [0] : vector<4x128xf32> to vector<128xf32>
    %3 = vector.shape_cast %2 : vector<128xf32> to vector<1x128xf32>
    %4 = vector.broadcast %3 : vector<1x128xf32> to vector<4x128xf32>
    %5 = arith.subf %1, %4 : vector<4x128xf32>
    %6 = math.exp %5 : vector<4x128xf32>
    %cst_2 = arith.constant dense<0.000000e+00> : vector<128xf32>
    %7 = vector.multi_reduction <add>, %6, %cst_2 [0] : vector<4x128xf32> to vector<128xf32>
    %8 = vector.shape_cast %7 : vector<128xf32> to vector<1x128xf32>
    %9 = math.log %8 : vector<1x128xf32>
    %c0_3 = arith.constant 0 : index
    %c0_4 = arith.constant 0 : index
    %c0_5 = arith.constant 0 : index
    %10 = vector.load %arg3[%c0_3, %c0_4, %c0_5] : memref<1x1x128xi32, #tpu.memory_space<vmem>>, vector<1x1x128xi32>
    %11 = vector.shape_cast %10 : vector<1x1x128xi32> to vector<1x128xi32>
    %12 = tpu.iota {dimensions = array<i32: 0>} : vector<4x128xi32>
    %13 = vector.broadcast %11 : vector<1x128xi32> to vector<4x128xi32>
    %14 = arith.cmpi eq, %12, %13 : vector<4x128xi32>
    %cst_6 = arith.constant 0.000000e+00 : f32
    %15 = vector.broadcast %cst_6 : f32 to vector<4x128xf32>
    %16 = arith.select %14, %5, %15 : vector<4x128xi1>, vector<4x128xf32>
    %cst_7 = arith.constant dense<0.000000e+00> : vector<128xf32>
    %17 = vector.multi_reduction <add>, %16, %cst_7 [0] : vector<4x128xf32> to vector<128xf32>
    %18 = vector.shape_cast %17 : vector<128xf32> to vector<1x128xf32>
    %19 = arith.subf %9, %18 : vector<1x128xf32>
    %20 = vector.shape_cast %19 : vector<1x128xf32> to vector<1x1x128xf32>
    %cst_8 = arith.constant dense<0.000000e+00> : vector<1xf32>
    %21 = vector.multi_reduction <add>, %20, %cst_8 [1, 2] : vector<1x1x128xf32> to vector<1xf32>
    %22 = vector.shape_cast %21 : vector<1xf32> to vector<1x1x1xf32>
    %23 = vector.extract %22[0, 0, 0] : f32 from vector<1x1x1xf32>
    %24 = tpu.iota {dimensions = array<i32: 1>} : vector<1x8x128xi32>
    %25 = tpu.iota {dimensions = array<i32: 2>} : vector<1x8x128xi32>
    %c0_i32 = arith.constant 0 : i32
    %26 = vector.broadcast %c0_i32 : i32 to vector<1x8x128xi32>
    %27 = arith.cmpi eq, %24, %26 : vector<1x8x128xi32>
    %c0_i32_9 = arith.constant 0 : i32
    %28 = vector.broadcast %c0_i32_9 : i32 to vector<1x8x128xi32>
    %29 = arith.cmpi eq, %25, %28 : vector<1x8x128xi32>
    %30 = arith.andi %27, %29 : vector<1x8x128xi1>
    %cst_10 = arith.constant 0.000000e+00 : f32
    %31 = vector.broadcast %23 : f32 to vector<1x8x128xf32>
    %32 = vector.broadcast %cst_10 : f32 to vector<1x8x128xf32>
    %33 = arith.select %30, %31, %32 : vector<1x8x128xi1>, vector<1x8x128xf32>
    %c0_11 = arith.constant 0 : index
    %c0_12 = arith.constant 0 : index
    %c0_13 = arith.constant 0 : index
    %34 = vector.load %arg4[%c0_11, %c0_12, %c0_13] : memref<1x8x128xf32, #tpu.memory_space<vmem>>, vector<1x8x128xf32>
    tpu.vector_store %arg4[%c0_11, %c0_12, %c0_13], %33 {strides = array<i32>} : memref<1x8x128xf32, #tpu.memory_space<vmem>>, vector<1x8x128xf32>,
    return
  }
  func.func @transform_0(%arg0: i32, %arg1: i32) -> (i32, i32, i32) {
    %c0_i32 = arith.constant 0 : i32
    %c0_i32_0 = arith.constant 0 : i32
    return %arg0, %c0_i32, %arg1 : i32, i32, i32
  }
  func.func @transform_1(%arg0: i32, %arg1: i32) -> (i32, i32, i32) {
    %c0_i32 = arith.constant 0 : i32
    %c0_i32_0 = arith.constant 0 : i32
    return %arg0, %c0_i32, %arg1 : i32, i32, i32
  }
  func.func @transform_2(%arg0: i32, %arg1: i32) -> (i32, i32, i32) {
    %c0_i32 = arith.constant 0 : i32
    %c0_i32_0 = arith.constant 0 : i32
    return %arg0, %arg1, %c0_i32 : i32, i32, i32
  }
}

</mosaic_0001>

<bundles_post_ra>
// kernel: tpu_custom_call.1
= control target key start
LH: loop header
LB: loop body
LE: loop exit
PB: predicated region body
PF: predicated region fallthrough
CT: control target
= control target key end

     0   :  { %7 = vsyncpa [#allocation3], 0  ;;  %s928_s0 = inlined_call_operand.hbm [shape: f32[2,4,256], index: 0, kind: input, shape index: {}]   ;;  %s929_s1 = inlined_call_operand.hbm [shape: s32[2,1,256], index: 1, kind: input, shape index: {}]   ;;  %s930_s2 = inlined_call_operand.hbm [shape: f32[2,16,128], index: 2, kind: output, shape index: {}]  }
   0x1   :  { %9 = vsyncpa [#allocation3 + $0x1], 0 }
   0x2   :  { %10 = vsyncpa [#allocation6], 0 }
   0x3   :  { %12 = vsyncpa [#allocation6 + $0x1], 0 }
   0x4   :  { %13 = vsyncpa [#allocation4], 0 }
   0x5   :  { %15 = vsyncpa [#allocation4 + $0x1], 0  ;;  %s684_s9 = smov 0   ;;  %s686_s10 = smov 0  }
   0x6   :  { %s688_s11 = smov 0   ;;  %s690_s12 = smov 0  }
   0x7   :  { %s692_s13 = smov 0   ;;  %s694_s14 = smov 0  }
   0x8   :  { %s696_s15 = smov 0   ;;  %s698_s16 = smov 0  }
   0x9 LB: > { %s395_s17 = sadd.s32 4294967295, %s664_s16   ;;  %s396_s18 = sadd.s32 4294967294, %s664_s16   ;;  %s664_s16 = sphi %s698_s16, %s21_s16   ;;  %s660_s15 = sphi %s696_s15, %s951_s15   ;;  %s656_s14 = sphi %s694_s14, %s950_s14   ;;  %s652_s13 = sphi %s692_s13, %s949_s13   ;;  %s648_s12 = sphi %s690_s12, %s948_s12   ;;  %s644_s11 = sphi %s688_s11, %s947_s11   ;;  %s640_s10 = sphi %s686_s10, %s946_s10   ;;  %s636_s9 = sphi %s684_s9, %s945_s9  }
   0xa   : > { %s30_s19 = sadd.s32 1, %s656_s14  ;;  %s33_s20 = sadd.s32 1, %s660_s15 }
   0xb   : > { %p31_p0 = scmp.ge.s32.totalorder %s30_s19, 2  ;;  %s42_s21 = sadd.s32 1, %s644_s11 }
   0xc   : > { %p49_p1 = scmp.ne.s32.totalorder %s644_s11, %s640_s10  ;;  %p50_p2 = scmp.eq.s32.totalorder %s664_s16, 0 }
   0xd   : > { %s953_s19 = smov (%p31_p0, %s30_s19), 0  ;;  %s955_s20 = smov (!%p31_p0, %s33_s20), %s660_s15 }
   0xe   : > { %s38_s22 = ssub.s32 %s656_s14, %s953_s19  ;;  %p737_p3 = por %p50_p2, %p49_p1 }
   0xf   : > { %p35_p4 = scmp.ge.s32.totalorder %s955_s20, 2  ;;  %p55_p5 = scmp.ne.s32.totalorder %s640_s10, %s636_s9 }
  0x10   : > { %p56_p6 = scmp.eq.s32.totalorder %s395_s17, 0  ;;  %p109_p7 = scmp.eq.s32.totalorder %s395_s17, 3 }
  0x11   : > { %s957_s20 = smov (%p35_p4, %s955_s20), 0  ;;  %p115_p10 = scmp.eq.s32.totalorder %s396_s18, 3 }
  0x12   : > { %p745_p8 = por %p56_p6, %p55_p5  ;;  %p749_p9 = por %p109_p7, %p49_p1 }
  0x13   : > { %s37_s26 = ssub.s32 %s660_s15, %s957_s20  ;;  %p755_p12 = por %p115_p10, %p55_p5 }
  0x14   : > { %s934_s24 = scalar_select %p745_p8, 1, 0 }
  0x15   : > { %s935_s25 = scalar_select %p749_p9, 1, 0 }
  0x16   : > { %s39_s27 = sor.u32 %s38_s22, %s37_s26  ;;  %p432_p13 = scmp.lt.s32.totalorder %s664_s16, 4 }
  0x17   : > { %p40_p11 = scmp.eq.s32.totalorder %s39_s27, 0  ;;  %s761_s29 = sand.u32 1, %s644_s11  }
  0x18   : > { %s936_s28 = scalar_select %p755_p12, 1, 0 }
  0x19   : > { %s764_s30 = scalar_select %p40_p11, %s644_s11, %s42_s21  }
  0x1a   : > { %s399_s3 = sshll.u32 %s761_s29, 2  ;;  %s400_s4 = sshll.u32 %s660_s15, 1 }
  0x1b   : > { %s769_s5 = sadd.s32 %s656_s14, %s400_s4  ;;  %s139_s6 = scalar_lea.vmem [#allocation2], %s399_s3 }
  0x1c   : > { %s148_s7 = sshll.u32 %s139_s6, 4  ;;  %s401_s8 = sshll.u32 %s769_s5, 6  ;;  %s772_s7 = int_to_ptr.vmem [resolvable:$true] %s148_s7 }
  0x1d   : > { %s777_s22 = scalar_lea.hbm %s928_s0, %s401_s8  ;;  %p781_p0 = pnand %p432_p13, %p737_p3 }
  0x1e   : > { %s136_s26 = scalar_lea.sflag [#allocation3], %s761_s29  ;;  %s502_s27 = scalar_lea.hbm %s777_s22, 64 }
  0x1f   : > { %p503_p4 = scmp.ne.s32.totalorder %s777_s22, %s502_s27  ;;  %p504_p5 = pneg %p781_p0 }
  0x20   : > { %s507_s4 = scalar_lea.hbm %s928_s0, 256  ;;  %p508_p3 = scmp.lt.u32.totalorder %s777_s22, %s928_s0 }
  0x21   : > { %p505_p6 = pnand %p504_p5, %p503_p4  ;;  %p509_p10 = scmp.lt.u32.totalorder %s507_s4, %s502_s27 }
  0x22   : > { %p511_p13 = scmp.lt.u32.totalorder %s502_s27, %s777_s22 }
  0x23   : > { %p506_p7 = pneg %p505_p6  ;;  %p510_p11 = por %p509_p10, %p508_p3 }
  0x25   : > { %p512_p1 = por %p511_p13, %p510_p11 }
  0x27   : > { %p513_p2 = pnand %p512_p1, %p506_p7 }
  0x29   : > { %516 = shalt.err (!%p513_p2)
}
  0x2a   : > { %s517_s17 = scalar_lea.vmem %s772_s7, 64  ;;  %s666_s18 = smov [#allocation2]  }
  0x2b   : > { %p518_p4 = scmp.ne.s32.totalorder %s772_s7, %s517_s17  ;;  %s522_s23 = sshll.u32 %s666_s18, 4  ;;  %s523_s23 = int_to_ptr.vmem [resolvable:$false] %s522_s23 }
  0x2c   : > { %s524_s3 = scalar_lea.vmem %s523_s23, 128  ;;  %p525_p9 = scmp.lt.s32.totalorder %s772_s7, %s523_s23 }
  0x2d   : > { %p520_p6 = pnand %p518_p4, %p504_p5  ;;  %p526_p3 = scmp.lt.s32.totalorder %s524_s3, %s517_s17 }
  0x2f   : > { %p521_p12 = pneg %p520_p6  ;;  %p527_p10 = por %p526_p3, %p525_p9 }
  0x31   : > { %p528_p11 = pnand %p527_p10, %p521_p12 }
  0x33   : > { %531 = shalt.err (!%p528_p11)
}
  0x34   : > { %424 = dma.hbm_to_vmem [thread:$0]  (!%p781_p0), %s777_s22, 64, %s772_s7, %s136_s26  }
  0x35   : > { %p938_p1 = scmp.lt.s32.totalorder %s664_s16, 5  ;;  %p939_p2 = scmp.ge.s32.totalorder %s664_s16, 1 }
  0x36   : > { %s403_s4 = sshll.u32 %s769_s5, 4  ;;  %s158_s6 = scalar_lea.vmem [#allocation5], %s761_s29 }
  0x37   : > { %p817_p7 = pnand %p939_p2, %p938_p1  ;;  %s167_s8 = sshll.u32 %s158_s6, 4  ;;  %s168_s8 = int_to_ptr.vmem [resolvable:$true] %s167_s8 }
  0x38   : > { %s826_s23 = scalar_lea.hbm %s929_s1, %s403_s4  ;;  %s156_s7 = scalar_lea.sflag [#allocation6], %s761_s29 }
  0x39   : > { %s940_s27 = scalar_select %p817_p7, 1, 0 }
  0x3a   : > { %s532_s22 = scalar_lea.hbm %s826_s23, 16  ;;  %s537_s3 = scalar_lea.hbm %s929_s1, 64 }
  0x3b   : > { %p533_p9 = scmp.ne.s32.totalorder %s826_s23, %s532_s22  ;;  %p538_p4 = scmp.lt.u32.totalorder %s826_s23, %s929_s1 }
  0x3c   : > { %p539_p6 = scmp.lt.u32.totalorder %s537_s3, %s532_s22  ;;  %p541_p10 = scmp.lt.u32.totalorder %s532_s22, %s826_s23 }
  0x3d   : > { %p535_p12 = pnand %p533_p9, %p504_p5 }
  0x3e   : > { %p540_p3 = por %p539_p6, %p538_p4 }
  0x3f   : > { %p536_p13 = pneg %p535_p12 }
  0x40   : > { %p542_p11 = por %p541_p10, %p540_p3 }
  0x42   : > { %p543_p1 = pnand %p542_p11, %p536_p13 }
  0x44   : > { %546 = shalt.err (!%p543_p1)
}
  0x45   : > { %s547_s29 = scalar_lea.vmem %s168_s8, 16  ;;  %s667_s4 = smov [#allocation5]  }
  0x46   : > { %p548_p2 = scmp.ne.s32.totalorder %s168_s8, %s547_s29  ;;  %s552_s18 = sshll.u32 %s667_s4, 4  ;;  %s553_s18 = int_to_ptr.vmem [resolvable:$false] %s552_s18 }
  0x47   : > { %s554_s5 = scalar_lea.vmem %s553_s18, 32  ;;  %p555_p8 = scmp.lt.s32.totalorder %s168_s8, %s553_s18 }
  0x48   : > { %p550_p9 = pnand %p548_p2, %p504_p5  ;;  %p556_p7 = scmp.lt.s32.totalorder %s554_s5, %s547_s29 }
  0x4a   : > { %p551_p12 = pneg %p550_p9  ;;  %p557_p4 = por %p556_p7, %p555_p8 }
  0x4c   : > { %p558_p6 = pnand %p557_p4, %p551_p12 }
  0x4e   : > { %561 = shalt.err (!%p558_p6)
}
  0x4f   : > { %427 = dma.hbm_to_vmem [thread:$0]  (!%p781_p0), %s826_s23, 16, %s168_s8, %s156_s7  }
  0x50   : > { %p941_p13 = scmp.ne.s32.totalorder %s940_s27, 0 }
  0x51   : > { %s851_s22 = sand.u32 (!%p941_p13), 1, %s640_s10   ;;  %p942_p5 = scmp.ne.s32.totalorder (!%p941_p13), %s934_s24, 0 }
  0x52   : > { %176 = sbr.rel (%p941_p13) target bundleno = 370 (0x172), region = 28  ;;  %s405_s26 = sshll.u32 (!%p941_p13), %s851_s22, 2 }
  0x53   : > { %s179_s3 = scalar_lea.sflag (!%p941_p13), [#allocation3], %s851_s22  ;;  %s182_s6 = scalar_lea.vmem (!%p941_p13), [#allocation2], %s405_s26 }
  0x59   : > { %623 = dma.done.wait (%p942_p5), %s179_s3, 64  }
  0x5a   : > { %625 = vsyncadd (%p942_p5), %s179_s3, 4294967232  ;;  %s188_s21 = scalar_lea.sflag [#allocation6], %s851_s22  ;;  %s190_s27 = scalar_lea.vmem [#allocation5], %s851_s22 }
  0x5b   : > { %627 = dma.done.wait (%p942_p5), %s188_s21, 16  }
  0x5c   : > { %629 = vsyncadd (%p942_p5), %s188_s21, 4294967280  ;;  %vm216_vm0 = vcmask 1043456   ;;  %v215_v0 = vld [vmem:[%s182_s6] sm:$0xf]  ;;  %v237_v9 = vlaneseq  ;;  %vm253_vm2 = vcmask 1040384   ;;  %s406_s24 = sshll.u32 %s851_s22, 3 }
  0x5d   : > { %v217_v1 = vsel %vm216_vm0, %v215_v0, -inf  ;;  %v407_v12 = vld [vmem:[%s190_s27] ss:$0 sm:$0xff]  ;;  %s409_s8 = sshll.u32 %s652_s13, 1  ;;  %s214_s17 = scalar_lea.vmem [#allocation7], %s406_s24 }
  0x5e   : > { %v218_v2 = vrot.slane %v217_v1, 4  ;;  %v238_v11 = vshrl.u32 %v237_v9, 7  ;;  %v265_v40 = vand.u32 127, %v237_v9  ;;  %s284_s23 = sadd.s32 %s648_s12, %s409_s8  ;;  %s288_s29 = sshll.u32 %s214_s17, 4  ;;  %s876_s29 = int_to_ptr.vmem [resolvable:$true] %s288_s29 }
  0x5f   : > { %s410_s7 = sshll.u32 %s284_s23, 7  ;;  %s273_s12 = scalar_lea.sflag [#allocation4], %s851_s22 }
  0x60   : > { %v219_v3 = vmax.f32 %v217_v1, %v218_v2  ;;  %vm243_vm1 = vcmp.eq.s32.totalorder %v238_v11, %v407_v12  ;;  %vm266_vm3 = vcmp.eq.s32.totalorder %v238_v11, 0  ;;  %vm267_vm4 = vcmp.eq.s32.totalorder %v265_v40, 0  ;;  %s874_s26 = scalar_lea.hbm %s930_s2, %s410_s7  ;;  %s562_s13 = scalar_lea.vmem %s876_s29, 128 }
  0x61   : > { %vm268_vm5 = vmand %vm266_vm3, %vm267_vm4  ;;  %p563_p8 = scmp.ne.s32.totalorder %s876_s29, %s562_s13  ;;  %p943_p0 = scmp.ne.s32.totalorder %s935_s25, 0 }
  0x62   : > { %v220_v4 = vrot.slane %v219_v3, 2  ;;  %s668_s3 = smov [#allocation7]  }
  0x63   : > { %p564_p7 = pnand %p563_p8, %p943_p0  ;;  %s566_s6 = sshll.u32 %s668_s3, 4  ;;  %s567_s6 = int_to_ptr.vmem [resolvable:$false] %s566_s6 }
  0x64   : > { %v221_v5 = vmax.f32 %v219_v3, %v220_v4  ;;  %s568_s21 = scalar_lea.vmem %s567_s6, 256  ;;  %p569_p10 = scmp.lt.s32.totalorder %s876_s29, %s567_s6 }
  0x65   : > { %p565_p3 = pneg %p564_p7  ;;  %p570_p11 = scmp.lt.s32.totalorder %s568_s21, %s562_s13 }
  0x66   : > { %v222_v6 = vrot.slane %v221_v5, 1 }
  0x67   : > { %p571_p1 = por %p570_p11, %p569_p10 }
  0x68   : > { %v223_v7 = vmax.f32 %v221_v5, %v222_v6 }
  0x69   : > { %p572_p2 = pnand %p571_p1, %p565_p3 }
  0x6a   : > { %v224_v8 = vsub.f32 %v215_v0, %v223_v7 }
  0x6c   : > { %v225_v10 = vmul.f32 1.442695, %v224_v8  ;;  %v244_v13 = vsel %vm243_vm1, %v224_v8, 0.0 }
  0x6d   : > { %v245_v15 = vsel %vm216_vm0, %v244_v13, 0.0 }
  0x6e   : > { %498 = vpow2.f32 %v225_v10  ;;  %v246_v18 = vrot.slane %v245_v15, 4 }
  0x70   : > { %v247_v21 = vadd.f32 %v246_v18, %v245_v15 }
  0x72   : > { %v248_v24 = vrot.slane %v247_v21, 2 }
  0x74   : > { %v249_v26 = vadd.f32 %v248_v24, %v247_v21 }
  0x76   : > { %v250_v27 = vrot.slane %v249_v26, 1 }
  0x78   : > { %v499_v14 = vpop.eup %498  ;;  %v251_v28 = vadd.f32 %v250_v27, %v249_v26 }
  0x79   : > { %v227_v16 = vsel %vm216_vm0, %v499_v14, 0.0 }
  0x7a   : > { %v228_v17 = vrot.slane %v227_v16, 4 }
  0x7c   : > { %v229_v19 = vadd.f32 %v228_v17, %v227_v16 }
  0x7e   : > { %v230_v20 = vrot.slane %v229_v19, 2 }
  0x80   : > { %v231_v22 = vadd.f32 %v230_v20, %v229_v19 }
  0x82   : > { %v232_v23 = vrot.slane %v231_v22, 1 }
  0x84   : > { %v233_v25 = vadd.f32 %v232_v23, %v231_v22 }
  0x86   : > { %500 = vlog2.f32 %v233_v25 }
  0x90   : > { %v501_v29 = vpop.eup %500 }
  0x91   : > { %v235_v30 = vmul.f32 0.6931472, %v501_v29 }
  0x93   : > { %v252_v31 = vsub.f32 %v235_v30, %v251_v28 }
  0x95   : > { %v254_v32 = vsel %vm253_vm2, %v252_v31, 0.0 }
  0x96   : > { %255 = vadd.xlane.f32.xlu0 %v254_v32 }
 0x123   : > { %v256_v33 = vpop.xlane.xlu0 %255 }
 0x124   : > { %v257_v34 = vrot.slane %v256_v33, 4 }
 0x126   : > { %v258_v35 = vadd.f32 %v257_v34, %v256_v33 }
 0x128   : > { %v259_v36 = vrot.slane %v258_v35, 2 }
 0x12a   : > { %v260_v37 = vadd.f32 %v259_v36, %v258_v35 }
 0x12c   : > { %v261_v38 = vrot.slane %v260_v37, 1 }
 0x12e   : > { %v262_v39 = vadd.f32 %v261_v38, %v260_v37 }
 0x130   : > { %413 = vpush %v262_v39 }
 0x161   : > { %s414_s4 = spop %413 }
 0x162   : > { %v269_v41 = vstv %s414_s4 }
 0x163   : > { %v270_v42 = vsel %vm268_vm5, %v269_v41, 0.0 }
 0x164   : > { %271 = vst [vmem:[%s214_s17] sm:$0xff] %v270_v42 }
 0x165   : > { %575 = shalt.err (!%p572_p2)
}
 0x166   : > { %s576_s22 = scalar_lea.hbm %s874_s26, 128  ;;  %s580_s8 = scalar_lea.hbm %s930_s2, 512 }
 0x167   : > { %p577_p9 = scmp.ne.s32.totalorder %s874_s26, %s576_s22  ;;  %p581_p6 = scmp.lt.u32.totalorder %s874_s26, %s930_s2 }
 0x168   : > { %p582_p13 = scmp.lt.u32.totalorder %s580_s8, %s576_s22  ;;  %p584_p8 = scmp.lt.u32.totalorder %s576_s22, %s874_s26 }
 0x169   : > { %p578_p12 = pnand %p577_p9, %p943_p0 }
 0x16a   : > { %p583_p5 = por %p582_p13, %p581_p6 }
 0x16b   : > { %p579_p4 = pneg %p578_p12 }
 0x16c   : > { %p585_p7 = por %p584_p8, %p583_p5 }
 0x16e   : > { %p586_p3 = pnand %p585_p7, %p579_p4 }
 0x170   : > { %589 = shalt.err (!%p586_p3)
}
 0x171   : > { %419 = dma.vmem_to_hbm [thread:$0]  (%p943_p0), %s876_s29, 128, %s874_s26, %s273_s12  }
 0x172 PF: > { %p433_p10 = scmp.ge.s32.totalorder %s664_s16, 2  ;;  %s300_s17 = sand.u32 1, %s636_s9  }
 0x173   : > { %p944_p11 = scmp.ne.s32.totalorder %s936_s28, 0  ;;  %s301_s4 = scalar_lea.sflag [#allocation4], %s300_s17 }
 0x175   : > { %p429_p1 = pnand %p433_p10, %p944_p11 }
 0x177   : > { %631 = dma.done.wait (!%p429_p1), %s301_s4, 128  }
 0x178   : > { %633 = vsyncadd (!%p429_p1), %s301_s4, 4294967168  ;;  %s21_s16 = sadd.s32 1, %s664_s16   ;;  %s945_s9 = smov %s640_s10 }
 0x179   : > { %p18_p2 = scmp.ge.s32.totalorder %s21_s16, 6   ;;  %s946_s10 = smov %s644_s11 }
 0x17a   : > { %s947_s11 = smov %s764_s30  ;;  %s948_s12 = smov %s656_s14 }
 0x17b   : > { %s949_s13 = smov %s660_s15  ;;  %s950_s14 = smov %s953_s19 }
 0x17c   : > { %s951_s15 = smov %s957_s20  ;;  %20 = sbr.rel (!%p18_p2) target bundleno = 9 (0x9), region = 86 }
 0x183   :  { %306 = vsyncpa [#allocation3], 1 }
 0x184   :  { %308 = vsyncpa [#allocation3 + $0x1], 1 }
 0x185   :  { %309 = vsyncpa [#allocation6], 1 }
 0x186   :  { %311 = vsyncpa [#allocation6 + $0x1], 1 }
 0x187   :  { %312 = vsyncpa [#allocation4], 1 }
 0x188   :  { %314 = vsyncpa [#allocation4 + $0x1], 1 }

</bundles_post_ra>
